<compile_context>
chip_gen: v7x
topology: tpu7x:2x2x1
jax: 0.10.0
libtpu: 0.0.40
codegen_flags: <defaults>
</compile_context>

<pallas_src>
import math
import numpy as np
import jax
import jax.numpy as jnp
from jax.experimental import pallas as pl
from jax.experimental.pallas import tpu as pltpu

NQUBITS = 4
NLAYERS = 2
DIM = 2 ** NQUBITS          # 16
NCLASS = 10
IN_FEATURES = 28 * 28       # 784
MAX_BATCH_TILE = 512        # rows per grid step; safe for v5e/v6e/v7x scoped-VMEM defaults


# ----------------------------- host-side constant folding (plain numpy, inference-time) --
# TODO(synk): these host-side folds block jit/grad through qnn_w/w2; fine for inference.

def _build_fixed_unitary(qnn_weights):
    """Real 16x16 matrix = product of all RY(weight) + CNOT-ring gates (post-RX)."""
    I2 = np.eye(2, dtype=np.float64)

    def ry(theta):
        c, s = math.cos(theta / 2.0), math.sin(theta / 2.0)
        return np.array([[c, -s], [s, c]], dtype=np.float64)

    def expand(g, wire):
        # convention: wire i is bit i (LSB) of the basis index
        mats = [I2] * NQUBITS
        mats[wire] = g
        full = np.array([[1.0]], dtype=np.float64)
        for w in reversed(range(NQUBITS)):
            full = np.kron(full, mats[w])
        return full

    def cnot(c_w, t_w):
        U = np.zeros((DIM, DIM), dtype=np.float64)
        for b in range(DIM):
            cb = (b >> c_w) & 1
            nb = b ^ (cb << t_w)
            U[nb, b] = 1.0
        return U

    U = np.eye(DIM, dtype=np.float64)
    for layer in range(NLAYERS):
        for i in range(NQUBITS):
            U = expand(ry(float(qnn_weights[i + layer * NQUBITS])), i) @ U
        for i in range(NQUBITS):
            U = cnot(i, (i + 1) % NQUBITS) @ U
    return U


def _fold_constants(params):
    """Pre-fold every parameter-only quantity into the minimal set of kernel operands."""
    U = _build_fixed_unitary(np.asarray(params["qnn_w"], dtype=np.float64))      # (16,16)
    Ut = U.T

    popcnt = np.array([bin(b).count("1") for b in range(DIM)], dtype=np.int64)
    phase_re = np.array([1.0, 0.0, -1.0, 0.0], dtype=np.float64)[popcnt % 4]     # (-i)^k re
    phase_im = np.array([0.0, -1.0, 0.0, 1.0], dtype=np.float64)[popcnt % 4]     # (-i)^k im
    # psi_{re,im} = (prod * phase) @ U^T  ==  prod @ (diag(phase) @ U^T); concat both halves.
    uri = np.concatenate([phase_re[:, None] * Ut, phase_im[:, None] * Ut], axis=1)  # (16,32)

    bits = np.array([[(b >> i) & 1 for b in range(DIM)] for i in range(NQUBITS)],
                    dtype=np.float64)                                            # (4,16)
    zsign = np.array([[1.0 - 2.0 * ((b >> i) & 1) for i in range(NQUBITS)]
                      for b in range(DIM)], dtype=np.float64)                    # (16,4)

    # fold zsign into the output layer: logits = probs @ (zsign @ W2^T) + b2
    m = zsign @ np.asarray(params["w2"], dtype=np.float64).T                     # (16,10)
    # fold 1/255 pixel scaling into W1:  (x/255) @ W1^T == x @ (W1^T/255)
    w1t = np.asarray(params["w1"], dtype=np.float64).T / 255.0                   # (784,4)

    return (
        jnp.asarray(w1t, jnp.bfloat16),                                          # (784,4) bf16
        jnp.asarray(np.asarray(params["b1"]), jnp.float32).reshape(1, NQUBITS),  # (1,4)
        jnp.asarray(uri, jnp.float32),                                           # (16,32)
        jnp.asarray(bits, jnp.float32),                                          # (4,16)
        jnp.asarray(m, jnp.float32),                                             # (16,10)
        jnp.asarray(np.asarray(params["b2"]), jnp.float32).reshape(1, NCLASS),   # (1,10)
    )


def init_params(key):
    """Deterministic synthetic parameters with the shapes implied by __init__."""
    k1, k2, k3, k4, k5 = jax.random.split(key, 5)
    bound1 = 1.0 / math.sqrt(IN_FEATURES)
    w1 = jax.random.uniform(k1, (NQUBITS, IN_FEATURES), jnp.float32, -bound1, bound1)
    b1 = jax.random.uniform(k2, (NQUBITS,), jnp.float32, -bound1, bound1)
    bound2 = 1.0 / math.sqrt(NQUBITS)
    w2 = jax.random.uniform(k3, (NCLASS, NQUBITS), jnp.float32, -bound2, bound2)
    b2 = jax.random.uniform(k4, (NCLASS,), jnp.float32, -bound2, bound2)
    qnn_w = jax.random.uniform(k5, (NLAYERS * NQUBITS,), jnp.float32) * jnp.float32(math.pi)
    return dict(w1=w1, b1=b1, w2=w2, b2=b2, qnn_w=qnn_w)


# ----------------------------- Pallas kernel (per batch tile) ----------------------------

def _hybrid_kernel(x_ref, w1t_ref, b1_ref, uri_ref, bits_ref, m_ref, b2_ref, o_ref):
    # reduction layer (1/255 already folded into w1t); bf16 inputs, f32 MXU accumulate
    h = jnp.dot(x_ref[...], w1t_ref[...], preferred_element_type=jnp.float32) + b1_ref[...]
    half = jnp.tanh(h) * jnp.float32(math.pi * 0.5)              # = (tanh(h)*pi)/2, (TB, 4)
    c = jnp.cos(half)
    s = jnp.sin(half)

    # product-state magnitudes after the RX layer: (TB, 16)
    bits = bits_ref[...]                                         # (4, 16)
    b0 = bits[0:1, :]
    prod = c[:, 0:1] * (1.0 - b0) + s[:, 0:1] * b0
    for i in range(1, NQUBITS):                                  # unrolled, 3 more iters
        bi = bits[i:i + 1, :]
        prod = prod * (c[:, i:i + 1] * (1.0 - bi) + s[:, i:i + 1] * bi)

    # phases + fixed real RY/CNOT circuit, both halves in one dot: (TB, 32)
    psi_ri = jnp.dot(prod, uri_ref[...], preferred_element_type=jnp.float32)
    sq = psi_ri * psi_ri
    probs = sq[:, :DIM] + sq[:, DIM:]                            # |psi|^2, (TB, 16)

    # folded (zsign @ W2^T) output layer
    o_ref[...] = jnp.dot(probs, m_ref[...], preferred_element_type=jnp.float32) + b2_ref[...]


# ----------------------------- wrapper ---------------------------------------------------

def _round_up(a, b):
    return (a + b - 1) // b * b


def hybrid_classifier_forward(x, params, *, max_tile=MAX_BATCH_TILE):
    """x: (B, 1, 28, 28) float32 pixel values in [0, 255]. Returns (B, 10) float32 logits."""
    B = x.shape[0]
    x_flat = jnp.reshape(x, (B, -1)).astype(jnp.bfloat16)        # nn.Flatten + bf16 HBM read
    assert x_flat.shape[1] == IN_FEATURES

    w1t, b1, uri, bits, m, b2 = _fold_constants(params)

    # batch tile: multiple of 8 sublanes, capped for portable VMEM budgets (v5e/v6e/v7x)
    tb = min(max_tile, _round_up(B, 8))
    b_pad = _round_up(B, tb)
    if b_pad != B:
        x_flat = jnp.pad(x_flat, ((0, b_pad - B), (0, 0)))       # zero rows -> harmless logits

    grid = (b_pad // tb,)

    out = pl.pallas_call(
        _hybrid_kernel,
        out_shape=jax.ShapeDtypeStruct((b_pad, NCLASS), jnp.float32),
        grid=grid,
        in_specs=[
            pl.BlockSpec((tb, IN_FEATURES), lambda i: (i, 0)),        # x: pipelined batch tile
            pl.BlockSpec((IN_FEATURES, NQUBITS), lambda i: (0, 0)),   # W1^T/255 (bf16), resident
            pl.BlockSpec((1, NQUBITS), lambda i: (0, 0)),             # b1
            pl.BlockSpec((DIM, 2 * DIM), lambda i: (0, 0)),           # [phase_re*U^T | phase_im*U^T]
            pl.BlockSpec((NQUBITS, DIM), lambda i: (0, 0)),           # qubit-bit table
            pl.BlockSpec((DIM, NCLASS), lambda i: (0, 0)),            # zsign @ W2^T
            pl.BlockSpec((1, NCLASS), lambda i: (0, 0)),              # b2
        ],
        out_specs=pl.BlockSpec((tb, NCLASS), lambda i: (i, 0)),
        compiler_params=pltpu.CompilerParams(
            dimension_semantics=("parallel",),                       # split batch across TCs (v7x)
        ),
    )(x_flat, w1t, b1, uri, bits, m, b2)

    return out[:B]


if __name__ == "__main__":
    key = jax.random.PRNGKey(0)
    pkey, xkey = jax.random.split(key)
    params = init_params(pkey)

    # small deterministic "MNIST-like" batch: (B, C, H, W) = (2, 1, 28, 28), pixels in [0, 255]
    x = jax.random.uniform(xkey, (2, 1, 28, 28), jnp.float32) * 255.0

    out = hybrid_classifier_forward(x, params)
    out = jax.block_until_ready(out)
    assert out.shape == (2, 10) and out.dtype == jnp.float32
    assert bool(jnp.all(jnp.isfinite(out)))
    print("KERNEL_OK")
</pallas_src>

<mosaic_0001>
module attributes {stable_mosaic.version = 11 : i64} {
  func.func @_hybrid_kernel(%arg0: i32, %arg1: memref<8x784xbf16, #tpu.memory_space<vmem>>, %arg2: memref<784x4xbf16, #tpu.memory_space<vmem>>, %arg3: memref<1x4xf32, #tpu.memory_space<vmem>>, %arg4: memref<16x32xf32, #tpu.memory_space<vmem>>, %arg5: memref<4x16xf32, #tpu.memory_space<vmem>>, %arg6: memref<16x10xf32, #tpu.memory_space<vmem>>, %arg7: memref<1x10xf32, #tpu.memory_space<vmem>>, %arg8: memref<8x10xf32, #tpu.memory_space<vmem>>) attributes {dimension_semantics = [#tpu.dimension_semantics<parallel>], iteration_bounds = array<i64: 1>, scalar_prefetch = 0 : i64, scratch_operands = 0 : i64, tpu.core_type = #tpu.core_type<tc>, window_params = [{transform_indices = @transform_0, window_bounds = array<i64: 8, 784>}, {pipeline_mode = #tpu.pipeline_mode<synchronous>, transform_indices = @transform_1, window_bounds = array<i64: 784, 4>}, {pipeline_mode = #tpu.pipeline_mode<synchronous>, transform_indices = @transform_2, window_bounds = array<i64: 1, 4>}, {pipeline_mode = #tpu.pipeline_mode<synchronous>, transform_indices = @transform_3, window_bounds = array<i64: 16, 32>}, {pipeline_mode = #tpu.pipeline_mode<synchronous>, transform_indices = @transform_4, window_bounds = array<i64: 4, 16>}, {pipeline_mode = #tpu.pipeline_mode<synchronous>, transform_indices = @transform_5, window_bounds = array<i64: 16, 10>}, {pipeline_mode = #tpu.pipeline_mode<synchronous>, transform_indices = @transform_6, window_bounds = array<i64: 1, 10>}, {transform_indices = @transform_7, window_bounds = array<i64: 8, 10>}]} {
    %c0 = arith.constant 0 : index
    %c0_0 = arith.constant 0 : index
    %0 = vector.load %arg1[%c0, %c0_0] : memref<8x784xbf16, #tpu.memory_space<vmem>>, vector<8x784xbf16>
    %c0_1 = arith.constant 0 : index
    %c0_2 = arith.constant 0 : index
    %1 = vector.load %arg2[%c0_1, %c0_2] : memref<784x4xbf16, #tpu.memory_space<vmem>>, vector<784x4xbf16>
    %cst = arith.constant dense<0.000000e+00> : vector<8x4xf32>
    %2 = tpu.matmul %0, %1, %cst {dimension_numbers = #tpu.dot_dimension_numbers<[1], [0], [0], [1], [0, 0, 1, 1], [], []>} : vector<8x784xbf16>, vector<784x4xbf16>, vector<8x4xf32> -> vector<8x4xf32>
    %c0_3 = arith.constant 0 : index
    %c0_4 = arith.constant 0 : index
    %3 = vector.load %arg3[%c0_3, %c0_4] : memref<1x4xf32, #tpu.memory_space<vmem>>, vector<1x4xf32>
    %4 = vector.broadcast %3 : vector<1x4xf32> to vector<8x4xf32>
    %5 = arith.addf %2, %4 : vector<8x4xf32>
    %6 = math.tanh %5 : vector<8x4xf32>
    %cst_5 = arith.constant 1.57079637 : f32
    %7 = vector.broadcast %cst_5 : f32 to vector<8x4xf32>
    %8 = arith.mulf %6, %7 : vector<8x4xf32>
    %9 = math.cos %8 : vector<8x4xf32>
    %10 = math.sin %8 : vector<8x4xf32>
    %c0_6 = arith.constant 0 : index
    %c0_7 = arith.constant 0 : index
    %11 = vector.load %arg5[%c0_6, %c0_7] : memref<4x16xf32, #tpu.memory_space<vmem>>, vector<4x16xf32>
    %12 = vector.extract_strided_slice %11 {offsets = [0, 0], sizes = [1, 16], strides = [1, 1]} : vector<4x16xf32> to vector<1x16xf32>
    %13 = vector.extract_strided_slice %9 {offsets = [0, 0], sizes = [8, 1], strides = [1, 1]} : vector<8x4xf32> to vector<8x1xf32>
    %cst_8 = arith.constant 1.000000e+00 : f32
    %14 = vector.broadcast %cst_8 : f32 to vector<1x16xf32>
    %15 = arith.subf %14, %12 : vector<1x16xf32>
    %16 = vector.broadcast %13 : vector<8x1xf32> to vector<8x16xf32>
    %17 = vector.broadcast %15 : vector<1x16xf32> to vector<8x16xf32>
    %18 = arith.mulf %16, %17 : vector<8x16xf32>
    %19 = vector.extract_strided_slice %10 {offsets = [0, 0], sizes = [8, 1], strides = [1, 1]} : vector<8x4xf32> to vector<8x1xf32>
    %20 = vector.broadcast %19 : vector<8x1xf32> to vector<8x16xf32>
    %21 = vector.broadcast %12 : vector<1x16xf32> to vector<8x16xf32>
    %22 = arith.mulf %20, %21 : vector<8x16xf32>
    %23 = arith.addf %18, %22 : vector<8x16xf32>
    %24 = vector.extract_strided_slice %11 {offsets = [1, 0], sizes = [1, 16], strides = [1, 1]} : vector<4x16xf32> to vector<1x16xf32>
    %25 = vector.extract_strided_slice %9 {offsets = [0, 1], sizes = [8, 1], strides = [1, 1]} : vector<8x4xf32> to vector<8x1xf32>
    %cst_9 = arith.constant 1.000000e+00 : f32
    %26 = vector.broadcast %cst_9 : f32 to vector<1x16xf32>
    %27 = arith.subf %26, %24 : vector<1x16xf32>
    %28 = vector.broadcast %25 : vector<8x1xf32> to vector<8x16xf32>
    %29 = vector.broadcast %27 : vector<1x16xf32> to vector<8x16xf32>
    %30 = arith.mulf %28, %29 : vector<8x16xf32>
    %31 = vector.extract_strided_slice %10 {offsets = [0, 1], sizes = [8, 1], strides = [1, 1]} : vector<8x4xf32> to vector<8x1xf32>
    %32 = vector.broadcast %31 : vector<8x1xf32> to vector<8x16xf32>
    %33 = vector.broadcast %24 : vector<1x16xf32> to vector<8x16xf32>
    %34 = arith.mulf %32, %33 : vector<8x16xf32>
    %35 = arith.addf %30, %34 : vector<8x16xf32>
    %36 = arith.mulf %23, %35 : vector<8x16xf32>
    %37 = vector.extract_strided_slice %11 {offsets = [2, 0], sizes = [1, 16], strides = [1, 1]} : vector<4x16xf32> to vector<1x16xf32>
    %38 = vector.extract_strided_slice %9 {offsets = [0, 2], sizes = [8, 1], strides = [1, 1]} : vector<8x4xf32> to vector<8x1xf32>
    %cst_10 = arith.constant 1.000000e+00 : f32
    %39 = vector.broadcast %cst_10 : f32 to vector<1x16xf32>
    %40 = arith.subf %39, %37 : vector<1x16xf32>
    %41 = vector.broadcast %38 : vector<8x1xf32> to vector<8x16xf32>
    %42 = vector.broadcast %40 : vector<1x16xf32> to vector<8x16xf32>
    %43 = arith.mulf %41, %42 : vector<8x16xf32>
    %44 = vector.extract_strided_slice %10 {offsets = [0, 2], sizes = [8, 1], strides = [1, 1]} : vector<8x4xf32> to vector<8x1xf32>
    %45 = vector.broadcast %44 : vector<8x1xf32> to vector<8x16xf32>
    %46 = vector.broadcast %37 : vector<1x16xf32> to vector<8x16xf32>
    %47 = arith.mulf %45, %46 : vector<8x16xf32>
    %48 = arith.addf %43, %47 : vector<8x16xf32>
    %49 = arith.mulf %36, %48 : vector<8x16xf32>
    %50 = vector.extract_strided_slice %11 {offsets = [3, 0], sizes = [1, 16], strides = [1, 1]} : vector<4x16xf32> to vector<1x16xf32>
    %51 = vector.extract_strided_slice %9 {offsets = [0, 3], sizes = [8, 1], strides = [1, 1]} : vector<8x4xf32> to vector<8x1xf32>
    %cst_11 = arith.constant 1.000000e+00 : f32
    %52 = vector.broadcast %cst_11 : f32 to vector<1x16xf32>
    %53 = arith.subf %52, %50 : vector<1x16xf32>
    %54 = vector.broadcast %51 : vector<8x1xf32> to vector<8x16xf32>
    %55 = vector.broadcast %53 : vector<1x16xf32> to vector<8x16xf32>
    %56 = arith.mulf %54, %55 : vector<8x16xf32>
    %57 = vector.extract_strided_slice %10 {offsets = [0, 3], sizes = [8, 1], strides = [1, 1]} : vector<8x4xf32> to vector<8x1xf32>
    %58 = vector.broadcast %57 : vector<8x1xf32> to vector<8x16xf32>
    %59 = vector.broadcast %50 : vector<1x16xf32> to vector<8x16xf32>
    %60 = arith.mulf %58, %59 : vector<8x16xf32>
    %61 = arith.addf %56, %60 : vector<8x16xf32>
    %62 = arith.mulf %49, %61 : vector<8x16xf32>
    %c0_12 = arith.constant 0 : index
    %c0_13 = arith.constant 0 : index
    %63 = vector.load %arg4[%c0_12, %c0_13] : memref<16x32xf32, #tpu.memory_space<vmem>>, vector<16x32xf32>
    %cst_14 = arith.constant dense<0.000000e+00> : vector<8x32xf32>
    %64 = tpu.matmul %62, %63, %cst_14 {dimension_numbers = #tpu.dot_dimension_numbers<[1], [0], [0], [1], [0, 0, 1, 1], [], []>} : vector<8x16xf32>, vector<16x32xf32>, vector<8x32xf32> -> vector<8x32xf32>
    %65 = arith.mulf %64, %64 : vector<8x32xf32>
    %66 = vector.extract_strided_slice %65 {offsets = [0, 0], sizes = [8, 16], strides = [1, 1]} : vector<8x32xf32> to vector<8x16xf32>
    %67 = vector.extract_strided_slice %65 {offsets = [0, 16], sizes = [8, 16], strides = [1, 1]} : vector<8x32xf32> to vector<8x16xf32>
    %68 = arith.addf %66, %67 : vector<8x16xf32>
    %c0_15 = arith.constant 0 : index
    %c0_16 = arith.constant 0 : index
    %69 = vector.load %arg6[%c0_15, %c0_16] : memref<16x10xf32, #tpu.memory_space<vmem>>, vector<16x10xf32>
    %cst_17 = arith.constant dense<0.000000e+00> : vector<8x10xf32>
    %70 = tpu.matmul %68, %69, %cst_17 {dimension_numbers = #tpu.dot_dimension_numbers<[1], [0], [0], [1], [0, 0, 1, 1], [], []>} : vector<8x16xf32>, vector<16x10xf32>, vector<8x10xf32> -> vector<8x10xf32>
    %c0_18 = arith.constant 0 : index
    %c0_19 = arith.constant 0 : index
    %71 = vector.load %arg7[%c0_18, %c0_19] : memref<1x10xf32, #tpu.memory_space<vmem>>, vector<1x10xf32>
    %72 = vector.broadcast %71 : vector<1x10xf32> to vector<8x10xf32>
    %73 = arith.addf %70, %72 : vector<8x10xf32>
    %c0_20 = arith.constant 0 : index
    %c0_21 = arith.constant 0 : index
    %74 = vector.load %arg8[%c0_20, %c0_21] : memref<8x10xf32, #tpu.memory_space<vmem>>, vector<8x10xf32>
    tpu.vector_store %arg8[%c0_20, %c0_21], %73 {strides = array<i32>} : memref<8x10xf32, #tpu.memory_space<vmem>>, vector<8x10xf32>,
    return
  }
  func.func @transform_0(%arg0: i32) -> (i32, i32) {
    %c0_i32 = arith.constant 0 : i32
    %c0_i32_0 = arith.constant 0 : i32
    return %arg0, %c0_i32 : i32, i32
  }
  func.func @transform_1(%arg0: i32) -> (i32, i32) {
    %c0_i32 = arith.constant 0 : i32
    %c0_i32_0 = arith.constant 0 : i32
    %c0_i32_1 = arith.constant 0 : i32
    return %c0_i32, %c0_i32_0 : i32, i32
  }
  func.func @transform_2(%arg0: i32) -> (i32, i32) {
    %c0_i32 = arith.constant 0 : i32
    %c0_i32_0 = arith.constant 0 : i32
    %c0_i32_1 = arith.constant 0 : i32
    return %c0_i32, %c0_i32_0 : i32, i32
  }
  func.func @transform_3(%arg0: i32) -> (i32, i32) {
    %c0_i32 = arith.constant 0 : i32
    %c0_i32_0 = arith.constant 0 : i32
    %c0_i32_1 = arith.constant 0 : i32
    return %c0_i32, %c0_i32_0 : i32, i32
  }
  func.func @transform_4(%arg0: i32) -> (i32, i32) {
    %c0_i32 = arith.constant 0 : i32
    %c0_i32_0 = arith.constant 0 : i32
    %c0_i32_1 = arith.constant 0 : i32
    return %c0_i32, %c0_i32_0 : i32, i32
  }
  func.func @transform_5(%arg0: i32) -> (i32, i32) {
    %c0_i32 = arith.constant 0 : i32
    %c0_i32_0 = arith.constant 0 : i32
    %c0_i32_1 = arith.constant 0 : i32
    return %c0_i32, %c0_i32_0 : i32, i32
  }
  func.func @transform_6(%arg0: i32) -> (i32, i32) {
    %c0_i32 = arith.constant 0 : i32
    %c0_i32_0 = arith.constant 0 : i32
    %c0_i32_1 = arith.constant 0 : i32
    return %c0_i32, %c0_i32_0 : i32, i32
  }
  func.func @transform_7(%arg0: i32) -> (i32, i32) {
    %c0_i32 = arith.constant 0 : i32
    %c0_i32_0 = arith.constant 0 : i32
    return %arg0, %c0_i32 : i32, i32
  }
}

</mosaic_0001>

<bundles_post_ra>
// kernel: tpu_custom_call.1
= control target key start
LH: loop header
LB: loop body
LE: loop exit
PB: predicated region body
PF: predicated region fallthrough
CT: control target
= control target key end

     0   :  { %v1370_v43 = vmov 0.0   ;;  %vm1371_vm0 = vmmov 0   ;;  %s1648_s0 = inlined_call_operand.vmem [shape: bf16[8,784], index: 0, kind: input, shape index: {}]   ;;  %s1649_s1 = inlined_call_operand.vmem [shape: bf16[784,4], index: 1, kind: input, shape index: {}]   ;;  %s1650_s2 = inlined_call_operand.vmem [shape: f32[1,4], index: 2, kind: input, shape index: {}]   ;;  %s1651_s3 = inlined_call_operand.vmem [shape: f32[16,32], index: 3, kind: input, shape index: {}]   ;;  %s1652_s4 = inlined_call_operand.vmem [shape: f32[4,16], index: 4, kind: input, shape index: {}]   ;;  %s1653_s5 = inlined_call_operand.vmem [shape: f32[16,10], index: 5, kind: input, shape index: {}]   ;;  %s1654_s6 = inlined_call_operand.vmem [shape: f32[1,10], index: 6, kind: input, shape index: {}]   ;;  %s1655_s7 = inlined_call_operand.hbm [shape: f32[8,10], index: 7, kind: output, shape index: {}]  }
   0x1   :  { %v1284_v0 = vld [vmem:[%s1649_s1 + $0x40] sm:$0xff]   ;;  %v1288_v4 = vld [vmem:[%s1649_s1 + $0x48] sm:$0xff]   ;;  %v1292_v8 = vld [vmem:[%s1649_s1 + $0x50] sm:$0xff]  }
   0x2   :  { %v1285_v1 = vld [vmem:[%s1649_s1] sm:$0xff]   ;;  %1159 = vmatprep.subr.bf16.mxu0 %v1284_v0  ;;  %v1289_v5 = vld [vmem:[%s1649_s1 + $0x8] sm:$0xff]   ;;  %v1293_v9 = vld [vmem:[%s1649_s1 + $0x10] sm:$0xff]  }
   0x3   :  { %v1286_v2 = vld [vmem:[%s1649_s1 + $0xc0] sm:$0xff]   ;;  %1160 = vmatpush3.bf16.msra.mxu0 %v1285_v1  ;;  %v1290_v6 = vld [vmem:[%s1649_s1 + $0xc8] sm:$0xff]   ;;  %v1294_v10 = vld [vmem:[%s1649_s1 + $0xd0] sm:$0xff]  }
   0x4   :  { %v1287_v3 = vld [vmem:[%s1649_s1 + $0x80] sm:$0xff]   ;;  %1181 = vmatprep.subr.bf16.mxu1 %v1286_v2  ;;  %1161 = vmatprep.subr.bf16.mxu0 %v1288_v4  ;;  %v1291_v7 = vld [vmem:[%s1649_s1 + $0x88] sm:$0xff]   ;;  %v1295_v11 = vld [vmem:[%s1649_s1 + $0x90] sm:$0xff]  }
   0x5   :  { %1182 = vmatpush3.bf16.msra.mxu1 %v1287_v3  ;;  %v1296_v12 = vld [vmem:[%s1649_s1 + $0x58] sm:$0xff]   ;;  %v1300_v16 = vld [vmem:[%s1649_s1 + $0x60] sm:$0xff]   ;;  %v1304_v20 = vld [vmem:[%s1649_s1 + $0x68] sm:$0xff]  }
   0x6   :  { %1183 = vmatprep.subr.bf16.mxu1 %v1290_v6  ;;  %v1297_v13 = vld [vmem:[%s1649_s1 + $0x18] sm:$0xff]   ;;  %v1301_v17 = vld [vmem:[%s1649_s1 + $0x20] sm:$0xff]   ;;  %v1305_v21 = vld [vmem:[%s1649_s1 + $0x28] sm:$0xff]  }
   0x7   :  { %1162 = vmatpush3.bf16.msra.mxu0 %v1289_v5  ;;  %v1298_v14 = vld [vmem:[%s1649_s1 + $0xd8] sm:$0xff]   ;;  %v1302_v18 = vld [vmem:[%s1649_s1 + $0xe0] sm:$0xff]   ;;  %v1306_v22 = vld [vmem:[%s1649_s1 + $0xe8] sm:$0xff]  }
   0x8   :  { %1163 = vmatprep.subr.bf16.mxu0 %v1292_v8  ;;  %v1299_v15 = vld [vmem:[%s1649_s1 + $0x98] sm:$0xff]   ;;  %v1303_v19 = vld [vmem:[%s1649_s1 + $0xa0] sm:$0xff]   ;;  %v1307_v23 = vld [vmem:[%s1649_s1 + $0xa8] sm:$0xff]  }
   0x9   :  { %1184 = vmatpush3.bf16.msra.mxu1 %v1291_v7  ;;  %v1308_v24 = vld [vmem:[%s1649_s1 + $0x70] sm:$0xff]   ;;  %v1312_v28 = vld [vmem:[%s1649_s1 + $0x78] sm:$0xff]   ;;  %v28_v31 = vld [vmem:[%s1648_s0] sm:$0xff] }
   0xa   :  { %1185 = vmatprep.subr.bf16.mxu1 %v1294_v10  ;;  %v1309_v25 = vld [vmem:[%s1649_s1 + $0x30] sm:$0xff]   ;;  %v1313_v29 = vld [vmem:[%s1649_s1 + $0x38] sm:$0xff]   ;;  %v1091_v32 = vcombine.low %v28_v31, %v28_v31  ;;  %v1092_v33 = vcombine.high %v28_v31, %v28_v31  ;;  %v1318_v35 = vld [vmem:[%s1649_s1 + $0x140] sm:$0xff]  }
   0xb   :  { %1164 = vmatpush3.bf16.msra.mxu0 %v1293_v9  ;;  %v1310_v26 = vld [vmem:[%s1649_s1 + $0xf0] sm:$0xff]   ;;  %v1314_v30 = vld [vmem:[%s1649_s1 + $0xf8] sm:$0xff]   ;;  %v29_v36 = vld [vmem:[%s1648_s0 + $0x8] sm:$0xff] }
   0xc   :  { %1165 = vmatprep.subr.bf16.mxu0 %v1296_v12  ;;  %v1311_v27 = vld [vmem:[%s1649_s1 + $0xb0] sm:$0xff]   ;;  %v1317_v34 = vld [vmem:[%s1649_s1 + $0xb8] sm:$0xff]   ;;  %491 = vmatprep.mubr.bf16.mxu0 %v1092_v33  ;;  %v1093_v37 = vcombine.low %v29_v36, %v29_v36  ;;  %v1094_v38 = vcombine.high %v29_v36, %v29_v36  ;;  %v1321_v39 = vld [vmem:[%s1649_s1 + $0x100] sm:$0xff]  }
   0xd   :  { %1186 = vmatpush3.bf16.msra.mxu1 %v1295_v11  ;;  %v1322_v40 = vld [vmem:[%s1649_s1 + $0x148] sm:$0xff]   ;;  %v1324_v42 = vld [vmem:[%s1649_s1 + $0x150] sm:$0xff]   ;;  %v1326_v45 = vld [vmem:[%s1649_s1 + $0x158] sm:$0xff]  }
   0xe   :  { %1187 = vmatprep.subr.bf16.mxu1 %v1298_v14  ;;  %531 = vmatprep.mubr.bf16.mxu1 %v1094_v38  ;;  %v1323_v41 = vld [vmem:[%s1649_s1 + $0x108] sm:$0xff]   ;;  %v1325_v44 = vld [vmem:[%s1649_s1 + $0x110] sm:$0xff]   ;;  %v1327_v46 = vld [vmem:[%s1649_s1 + $0x118] sm:$0xff]  }
   0xf   :  { %1166 = vmatpush3.bf16.msra.mxu0 %v1297_v13  ;;  %v1328_v47 = vld [vmem:[%s1649_s1 + $0x160] sm:$0xff]   ;;  %v1330_v49 = vld [vmem:[%s1649_s1 + $0x168] sm:$0xff]   ;;  %v30_v51 = vld [vmem:[%s1648_s0 + $0x10] sm:$0xff] }
  0x10   :  { %1167 = vmatprep.subr.bf16.mxu0 %v1300_v16  ;;  %v1329_v48 = vld [vmem:[%s1649_s1 + $0x120] sm:$0xff]   ;;  %v1096_v52 = vcombine.high %v30_v51, %v30_v51  ;;  %v1339_v53 = vld [vmem:[%s1648_s0 + $0x18] ss:$0 sps:$4 sm:$0xff]  }
  0x11   :  { %1188 = vmatpush3.bf16.msra.mxu1 %v1299_v15  ;;  %v1336_v50 = vld [vmem:[%s1649_s1 + $0x180] sm:$0xff]  }
  0x12   :  { %1189 = vmatprep.subr.bf16.mxu1 %v1302_v18 }
  0x13   :  { %1168 = vmatpush3.bf16.msra.mxu0 %v1301_v17 }
  0x14   :  { %1169 = vmatprep.subr.bf16.mxu0 %v1304_v20 }
  0x15   :  { %1190 = vmatpush3.bf16.msra.mxu1 %v1303_v19 }
  0x16   :  { %1191 = vmatprep.subr.bf16.mxu1 %v1306_v22 }
  0x17   :  { %1170 = vmatpush3.bf16.msra.mxu0 %v1305_v21 }
  0x18   :  { %1171 = vmatprep.subr.bf16.mxu0 %v1308_v24 }
  0x19   :  { %1192 = vmatpush3.bf16.msra.mxu1 %v1307_v23 }
  0x1a   :  { %1193 = vmatprep.subr.bf16.mxu1 %v1310_v26 }
  0x1b   :  { %1172 = vmatpush3.bf16.msra.mxu0 %v1309_v25 }
  0x1c   :  { %1173 = vmatprep.subr.bf16.mxu0 %v1312_v28 }
  0x1d   :  { %1194 = vmatpush3.bf16.msra.mxu1 %v1311_v27 }
  0x1e   :  { %1195 = vmatprep.subr.bf16.mxu1 %v1314_v30 }
  0x1f   :  { %1174 = vmatpush3.bf16.msra.mxu0 %v1313_v29 }
  0x20   :  { %1203 = vmatprep.subr.bf16.mxu0 %v1318_v35 }
  0x21   :  { %1196 = vmatpush3.bf16.msra.mxu1 %v1317_v34 }
  0x22   :  { %492 = vmatmul.mubr.bf16.vlgmr.msra.gmra.mrb[0].mxu0 %v1091_v32  ;;  %1233 = vmatprep.subr.bf16.mxu1 %v1370_v43 }
  0x23   :  { %1204 = vmatpush3.bf16.msra.mxu0 %v1321_v39 }
  0x24   :  { %532 = vmatmul.mubr.bf16.vlgmr.msra.gmra.mrb[0].mxu1 %v1093_v37  ;;  %1205 = vmatprep.subr.bf16.mxu0 %v1322_v40 }
  0x25   :  { %1235 = vmatprep.mubr.msk.bf16.mxu1 %vm1371_vm0, %v1370_v43 }
  0x27   :  { %1206 = vmatpush3.bf16.msra.mxu0 %v1323_v41 }
  0x28   :  { %1207 = vmatprep.subr.bf16.mxu0 %v1324_v42 }
  0x2b   :  { %1208 = vmatpush3.bf16.msra.mxu0 %v1325_v44 }
  0x2c   :  { %1209 = vmatprep.subr.bf16.mxu0 %v1326_v45 }
  0x2f   :  { %1210 = vmatpush3.bf16.msra.mxu0 %v1327_v46 }
  0x30   :  { %1211 = vmatprep.subr.bf16.mxu0 %v1328_v47 }
  0x31   :  { %12 = vsyncpa [#allocation3], 0  ;;  %1234 = vmatpush3.bf16.msra.mxu1 %v1336_v50  ;;  %vm455_vm1 = vcmask 130048   ;;  %v1331_v54 = vld [vmem:[%s1649_s1 + $0x128] sm:$0xff]   ;;  %571 = vmatprep.mubr.bf16.mxu0 %v1096_v52  ;;  %v1332_v55 = vld [vmem:[%s1649_s1 + $0x170] sm:$0xff]   ;;  %v1095_v59 = vcombine.low %v30_v51, %v30_v51  ;;  %v1372_v60 = vmov 1  }
  0x32   :  { %v1333_v56 = vld [vmem:[%s1649_s1 + $0x130] sm:$0xff]   ;;  %v1334_v57 = vld [vmem:[%s1649_s1 + $0x178] sm:$0xff]   ;;  %1279 = vset.pattern.permute.xlu1 %v1372_v60  ;;  %v1373_v61 = vmov 0   ;;  %v1090_v63 = vld [vmem:[%s1650_s2] ss:$0 sm:$0xff]  ;;  %s1383_s22 = smov 112  }
  0x33   :  { %1212 = vmatpush3.bf16.msra.mxu0 %v1329_v48  ;;  %v1335_v58 = vld [vmem:[%s1649_s1 + $0x138] sm:$0xff]   ;;  %1278 = vset.pattern.permute.xlu0 %v1373_v61  ;;  %v1374_v35 = vmov 2102212464   ;;  %v1375_v37 = vmov 920167782   ;;  %s1384_s25 = smov [#allocation2]  }
  0x34   :  { %1213 = vmatprep.subr.bf16.mxu0 %v1330_v49  ;;  %1236 = vmatmul.mubr.msk.bf16.vlgmr.msra.gmra.mrb[4].mxu1 %vm455_vm1, %v1339_v53  ;;  %v1376_v41 = vmov 1326507024   ;;  %v1377_v44 = vmov 683565275   ;;  %v1378_v46 = vmov 2475754826  }
  0x35   :  { %1243 = vmatprep.mubr.msk.f32.mxu1 %vm1371_vm0, %v1370_v43  ;;  %v1379_v49 = vmov 2131351028   ;;  %s1082_s26 = sshll.u32 %s1384_s25, 4  ;;  %s1083_s26 = int_to_ptr.vmem [resolvable:$true] %s1082_s26 }
  0x36   :  { %p1351_p1 = scmp.lt.s32.totalorder %s1083_s26, %s1083_s26 }
  0x37   :  { %1214 = vmatpush3.bf16.msra.mxu0 %v1331_v54 }
  0x38   :  { %1215 = vmatprep.subr.bf16.mxu0 %v1332_v55 }
  0x3b   :  { %1216 = vmatpush3.bf16.msra.mxu0 %v1333_v56 }
  0x3c   :  { %1217 = vmatprep.subr.bf16.mxu0 %v1334_v57 }
  0x3f   :  { %1218 = vmatpush3.bf16.msra.mxu0 %v1335_v58 }
  0x42   :  { %572 = vmatmul.mubr.bf16.vlgmr.msra.gmra.mrb[4].mxu0 %v1095_v59 }
  0xf5   :  { %v1175_v62 = vpop.f32.mrb[0].mxu0 }
  0xf6   :  { %v1176_v0 = vpop.f32.mrb[1].mxu0 }
  0xf7   :  { %v1177_v1 = vadd.f32 %v1176_v0, %v1175_v62  ;;  %v1178_v2 = vpop.f32.mrb[2].mxu0  ;;  %v1197_v3 = vpop.f32.mrb[0].mxu1 }
  0xf8   :  { %v1179_v4 = vpop.f32.mrb[3].mxu0  ;;  %v1198_v5 = vpop.f32.mrb[1].mxu1 }
  0xf9   :  { %v494_v6 = vadd.f32 %v1177_v1, %v1090_v63  ;;  %v1199_v7 = vadd.f32 %v1198_v5, %v1197_v3  ;;  %v1200_v8 = vpop.f32.mrb[2].mxu1 }
  0xfa   :  { %v1201_v9 = vpop.f32.mrb[3].mxu1 }
  0xfb   :  { %v534_v10 = vadd.f32 %v1199_v7, %v494_v6 }
 0x107   :  { %v613_v11 = vpop.f32.mrb[4].mxu1 }
 0x108   :  { %v1237_v12 = vpop.f32.mrb[5].mxu1 }
 0x109   :  { %v616_v13 = vpop.f32.mrb[6].mxu1 }
 0x10a   :  { %v1238_v14 = vpop.f32.mrb[7].mxu1 }
 0x115   :  { %v1219_v15 = vpop.f32.mrb[4].mxu0 }
 0x116   :  { %v1220_v16 = vpop.f32.mrb[5].mxu0 }
 0x117   :  { %v1221_v17 = vadd.f32 %v1220_v16, %v1219_v15  ;;  %v1222_v18 = vpop.f32.mrb[6].mxu0 }
 0x118   :  { %v1223_v19 = vpop.f32.mrb[7].mxu0 }
 0x119   :  { %v574_v20 = vadd.f32 %v1221_v17, %v534_v10 }
 0x11b   :  { %v614_v21 = vadd.f32 %v613_v11, %v574_v20 }
 0x11d   :  { %1340 = vtanh.f32 %v614_v21 }
 0x127   :  { %v1341_v22 = vpop.eup %1340 }
 0x128   :  { %v1593_v23 = vmul.f32 1.5707964, %v1341_v22 }
 0x12a   :  { %v624_v24 = vand.u32 2139095040, %v1593_v23  ;;  %v621_v25 = vand.u32 2147483647, %v1593_v23  ;;  %vm623_vm9 = vcmp.lt.s32.totalorder %v1593_v23, 0 }
 0x12c   :  { %v625_v26 = vshrl.u32 %v624_v24, 23  ;;  %v628_v28 = vand.u32 8388607, %v621_v25  ;;  %vm622_vm10 = vcmp.le.f32.partialorder %v621_v25, 0.7853982 }
 0x12e   :  { %v1148_v27 = vadd.s32 4294967169, %v625_v26  ;;  %v629_v31 = vor.u32 8388608, %v628_v28 }
 0x130   :  { %v631_v29 = vadd.s32 1, %v1148_v27  ;;  %v669_v39 = vshll.u32 %v629_v31, 8 }
 0x132   :  { %vm632_vm2 = vcmp.gt.s32.totalorder %v631_v29, 0 }
 0x133   :  { %v633_v30 = vsel %vm632_vm2, %v631_v29, 0 }
 0x134   :  { %v635_v32 = vand.u32 31, %v633_v30  ;;  %v634_v33 = vshrl.u32 %v633_v30, 5 }
 0x136   :  { %v636_v34 = vsub.s32 32, %v635_v32  ;;  %v647_v36 = vshll.u32 %v1374_v35, %v635_v32  ;;  %v650_v38 = vshll.u32 %v1375_v37, %v635_v32  ;;  %v638_v45 = vshll.u32 %v1377_v44, %v635_v32 }
 0x137   :  { %v641_v48 = vshll.u32 %v1378_v46, %v635_v32  ;;  %v644_v51 = vshll.u32 %v1379_v49, %v635_v32  ;;  %vm656_vm3 = vcmp.lt.s32.totalorder %v634_v33, 4  ;;  %vm653_vm4 = vcmp.lt.s32.totalorder %v634_v33, 1 }
 0x138   :  { %v648_v40 = vshrl.u32 %v1375_v37, %v636_v34  ;;  %v651_v42 = vshrl.u32 %v1376_v41, %v636_v34  ;;  %v639_v47 = vshrl.u32 %v1378_v46, %v636_v34  ;;  %v642_v50 = vshrl.u32 %v1379_v49, %v636_v34 }
 0x139   :  { %v645_v52 = vshrl.u32 %v1374_v35, %v636_v34  ;;  %v637_v56 = vshrl.u32 %v1377_v44, %v636_v34  ;;  %vm654_vm5 = vcmp.lt.s32.totalorder %v634_v33, 2  ;;  %vm655_vm6 = vcmp.lt.s32.totalorder %v634_v33, 3 }
 0x13a   :  { %v649_v53 = vor.u32 %v648_v40, %v647_v36  ;;  %v652_v54 = vor.u32 %v651_v42, %v650_v38  ;;  %v640_v55 = vor.u32 %v639_v47, %v638_v45  ;;  %v643_v57 = vor.u32 %v642_v50, %v641_v48 }
 0x13b   :  { %v646_v58 = vor.u32 %v645_v52, %v644_v51 }
 0x13c   :  { %v662_v59 = vsel %vm656_vm3, %v649_v53, 920167782  ;;  %v666_v60 = vsel %vm656_vm3, %v652_v54, 1326507024  ;;  %v661_v62 = vsel %vm653_vm4, %v640_v55, %v643_v57  ;;  %v657_v1 = vsel %vm653_vm4, %v637_v56, %v640_v55 }
 0x13d   :  { %v658_v61 = vsel %vm656_vm3, %v646_v58, 2102212464  ;;  %v663_v63 = vsel %vm655_vm6, %v646_v58, %v662_v59  ;;  %v665_v0 = vsel %vm653_vm4, %v643_v57, %v646_v58  ;;  %v667_v4 = vsel %vm655_vm6, %v649_v53, %v666_v60 }
 0x13e   :  { %v659_v2 = vsel %vm655_vm6, %v643_v57, %v658_v61  ;;  %v664_v3 = vsel %vm654_vm5, %v661_v62, %v663_v63  ;;  %v668_v5 = vsel %vm654_vm5, %v665_v0, %v667_v4  ;;  %vm713_vm3 = vweird.f32 %v1593_v23  ;;  %v912_v61 = vld [vmem:[%s1651_s3 + $0x8] sm:$0xff] }
 0x13f   :  { %v1599_v6 = vmul.u32.u64.low %v669_v39, %v664_v3  ;;  %v1600_v7 = vmul.u32.u64.high %v669_v39, %v664_v3, %v1599_v6  ;;  %v1602_v8 = vmul.u32.u64.low %v669_v39, %v668_v5  ;;  %v1603_v9 = vmul.u32.u64.high %v669_v39, %v668_v5, %v1602_v8 }
 0x140   :  { %v660_v10 = vsel %vm654_vm5, %v657_v1, %v659_v2  ;;  %v1380_v59 = vmov 2   ;;  %v1381_v60 = vmov 3   ;;  %v1382_v63 = vmov 0.0|0.0   ;;  %v828_v2 = vld [vmem:[%s1652_s4] sm:$0xf] }
 0x141   :  { %v679_v11 = vadd.s32 1, %v1600_v7  ;;  %v676_v12 = vmul.u32 %v669_v39, %v660_v10  ;;  %vm678_vm7 = vc.u32 %v1603_v9, %v1599_v6  ;;  %v677_v26 = vadd.s32 %v1599_v6, %v1603_v9  ;;  %1253 = vmatprep.subr.bf16.mxu1 %v1382_v63 }
 0x142   :  { %v835_v0 = vlaneseq  ;;  %v829_v5 = vsub.f32 1.0, %v828_v2 }
 0x143   :  { %v680_v13 = vsel %vm678_vm7, %v679_v11, %v1600_v7 }
 0x144   :  { %v681_v14 = vadd.s32 %v680_v13, %v676_v12  ;;  %v836_v1 = vshrl.u32 %v835_v0, 7 }
 0x146   :  { %v682_v15 = vadd.s32 536870912, %v681_v14  ;;  %v857_v6 = vsub.s32 1, %v836_v1  ;;  %v837_v7 = vsub.s32 0, %v836_v1  ;;  %v877_v8 = vsub.s32 2, %v836_v1 }
 0x148   :  { %v683_v16 = vshrl.u32 %v682_v15, 30  ;;  %v867_v9 = vrot.slane %v828_v2, %v857_v6  ;;  %v848_v10 = vrot.slane %v828_v2, %v837_v7  ;;  %v858_v13 = vrot.slane %v829_v5, %v857_v6 }
 0x149   :  { %v887_v15 = vrot.slane %v828_v2, %v877_v8 }
 0x14a   :  { %v684_v17 = vshll.u32 %v683_v16, 30  ;;  %v707_v38 = vsub.s32 4, %v683_v16 }
 0x14c   :  { %v685_v18 = vsub.s32 %v681_v14, %v684_v17  ;;  %v708_v41 = vsel %vm623_vm9, %v707_v38, %v683_v16  ;;  %v838_v14 = vrot.slane %v829_v5, %v837_v7  ;;  %v878_v16 = vrot.slane %v829_v5, %v877_v8 }
 0x14d   :  { %v710_v44 = vsel %vm622_vm10, 0, %v708_v41  ;;  %v992_v41 = vld [vmem:[%s1653_s5] sm:$0xff] }
 0x14e   :  { %v687_v19 = vsub.s32 0, %v685_v18  ;;  %v817_v45 = vadd.s32 3, %v710_v44  ;;  %v714_v46 = vand.u32 3, %v710_v44 }
 0x150   :  { %v1149_v20 = vmin.u32 %v687_v19, %v685_v18  ;;  %v818_v47 = vand.u32 3, %v817_v45  ;;  %vm719_vm11 = vcmp.eq.s32.totalorder %v714_v46, 2  ;;  %vm716_vm13 = vcmp.eq.s32.totalorder %v714_v46, 0 }
 0x151   :  { %vm715_vm15 = vcmp.lt.s32.totalorder %v714_v46, 2  ;;  %v897_v19 = vsub.s32 3, %v836_v1 }
 0x152   :  { %v689_v21 = vclz %v1149_v20  ;;  %vm823_vm12 = vcmp.eq.s32.totalorder %v818_v47, 2  ;;  %vm820_vm14 = vcmp.eq.s32.totalorder %v818_v47, 0  ;;  %vm819_vm2 = vcmp.lt.s32.totalorder %v818_v47, 2 }
 0x154   :  { %v1150_v22 = vadd.s32 4294967294, %v689_v21 }
 0x156   :  { %vm1151_vm8 = vcmp.lt.s32.totalorder %v1150_v22, 0 }
 0x157   :  { %v692_v24 = vsel %vm1151_vm8, 0, %v1150_v22 }
 0x158   :  { %v693_v27 = vsub.s32 32, %v692_v24  ;;  %v697_v28 = vsub.s32 4294967266, %v692_v24  ;;  %v694_v29 = vshll.u32 %v685_v18, %v692_v24 }
 0x15a   :  { %v695_v30 = vshrl.u32 %v677_v26, %v693_v27  ;;  %v698_v31 = vadd.s32 127, %v697_v28 }
 0x15c   :  { %v696_v32 = vor.u32 %v695_v30, %v694_v29  ;;  %v699_v33 = vshll.u32 %v698_v31, 23  ;;  %v898_v30 = vrot.slane %v829_v5, %v897_v19  ;;  %v907_v31 = vrot.slane %v828_v2, %v897_v19 }
 0x15e   :  { %v700_v34 = vor.u32 4788187, %v699_v33  ;;  %v703_v36 = vcvt.s32.f32 %v696_v32 }
 0x160   :  { %v701_v35 = vand.u32 2147483647, %v700_v34 }
 0x162   :  { %v704_v37 = vmul.f32 %v703_v36, %v701_v35 }
 0x164   :  { %v705_v39 = vxor.u32 2147483648, %v704_v37 }
 0x166   :  { %v706_v40 = vsel %vm623_vm9, %v705_v39, %v704_v37 }
 0x167   :  { %v709_v42 = vsel %vm622_vm10, %v1593_v23, %v706_v40  ;;  %v911_v23 = vld [vmem:[%s1651_s3] sm:$0xff] }
 0x168   :  { %1342 = vcosq.f32 %v709_v42  ;;  %v1254_v62 = vpack.c.bf16 %v912_v61, %v911_v23 }
 0x169   :  { %1344 = vsinq.f32 %v709_v42  ;;  %v993_v42 = vld [vmem:[%s1653_s5 + $0x8] sm:$0xff]  ;;  %s1346_s5 = scalar_lea.vmem %s1083_s26, 128 }
 0x16a   :  { %1255 = vmatpush3.bf16.msra.mxu1 %v1254_v62  ;;  %v1257_v44 = vpack.c.bf16 %v993_v42, %v992_v41  ;;  %p1347_p0 = scmp.ne.s32.totalorder %s1083_s26, %s1346_s5  ;;  %p1352_p2 = scmp.lt.s32.totalorder %s1346_s5, %s1346_s5 }
 0x16b   :  { %1256 = vmatprep.subr.bf16.mxu1 %v1382_v63 }
 0x16c   :  { %p1353_p3 = por %p1352_p2, %p1351_p1 }
 0x16e   :  { %p1354_p4 = pnand %p1353_p3, %p1347_p0 }
 0x172   :  { %v1343_v48 = vpop.eup %1342 }
 0x173   :  { %v1345_v49 = vpop.eup %1344  ;;  %v720_v50 = vxor.u32 2147483648, %v1343_v48 }
 0x174   :  { %v717_v51 = vxor.u32 2147483648, %v1345_v49 }
 0x175   :  { %v721_v52 = vsel %vm719_vm11, %v720_v50, %v1345_v49  ;;  %v825_v25 = vsel %vm823_vm12, %v720_v50, %v1345_v49 }
 0x176   :  { %v718_v53 = vsel %vm716_vm13, %v1343_v48, %v717_v51  ;;  %v822_v54 = vsel %vm820_vm14, %v1343_v48, %v717_v51 }
 0x177   :  { %v722_v55 = vsel %vm715_vm15, %v718_v53, %v721_v52  ;;  %v826_v56 = vsel %vm819_vm2, %v822_v54, %v825_v25 }
 0x178   :  { %v723_v57 = vsel %vm713_vm3, nan, %v722_v55  ;;  %v827_v58 = vsel %vm713_vm3, nan, %v826_v56 }
 0x179   :  { %852 = vperm.xlu1 %1279, %v723_v57   ;;  %832 = vperm.xlu0 %1278, %v723_v57  }
 0x17d   :  { %861 = vperm.xlu1 %1279, %v827_v58   ;;  %842 = vperm.xlu0 %1278, %v827_v58  }
 0x181   :  { %1281 = vset.pattern.permute.xlu1 %v1380_v59  ;;  %1280 = vset.pattern.permute.xlu0 %v1380_v59 }
 0x182   :  { %881 = vperm.xlu1 %1281, %v827_v58   ;;  %872 = vperm.xlu0 %1280, %v723_v57  }
 0x186   :  { %1282 = vset.pattern.permute.xlu1 %v1381_v60  ;;  %1283 = vset.pattern.permute.xlu0 %v1381_v60 }
 0x187   :  { %892 = vperm.xlu1 %1282, %v723_v57   ;;  %901 = vperm.xlu0 %1283, %v827_v58  }
 0x1f8   :  { %v853_v3 = vpop.permute.xlu1 %852  ;;  %v833_v4 = vpop.permute.xlu0 %832 }
 0x1f9   :  { %v859_v20 = vmul.f32 %v858_v13, %v853_v3  ;;  %v839_v21 = vmul.f32 %v838_v14, %v833_v4 }
 0x1fc   :  { %v862_v11 = vpop.permute.xlu1 %861  ;;  %v843_v12 = vpop.permute.xlu0 %842 }
 0x1fd   :  { %v868_v17 = vmul.f32 %v867_v9, %v862_v11  ;;  %v849_v18 = vmul.f32 %v848_v10, %v843_v12 }
 0x1ff   :  { %v869_v28 = vadd.f32 %v868_v17, %v859_v20  ;;  %v850_v29 = vadd.f32 %v849_v18, %v839_v21 }
 0x201   :  { %v882_v22 = vpop.permute.xlu1 %881  ;;  %v873_v24 = vpop.permute.xlu0 %872  ;;  %v870_v35 = vmul.f32 %v869_v28, %v850_v29 }
 0x202   :  { %v888_v26 = vmul.f32 %v887_v15, %v882_v22  ;;  %v879_v27 = vmul.f32 %v878_v16, %v873_v24 }
 0x204   :  { %v889_v32 = vadd.f32 %v888_v26, %v879_v27 }
 0x206   :  { %v893_v33 = vpop.permute.xlu1 %892  ;;  %v902_v34 = vpop.permute.xlu0 %901  ;;  %v890_v38 = vmul.f32 %v889_v32, %v870_v35 }
 0x207   :  { %v899_v36 = vmul.f32 %v898_v30, %v893_v33  ;;  %v908_v37 = vmul.f32 %v907_v31, %v902_v34 }
 0x209   :  { %v909_v39 = vadd.f32 %v908_v37, %v899_v36 }
 0x20b   :  { %v910_v40 = vmul.f32 %v909_v39, %v890_v38 }
 0x20d   :  { %1244 = vmatmul.mubr.msk.f32.vlgmr.msra.gmra.mrb[8].mxu1 %vm455_vm1, %v910_v40 }
 0x20e   :  { %1250 = vmatprep.mubr.msk.f32.mxu1 %vm1371_vm0, %v1370_v43  ;;  %1258 = vmatpush3.bf16.msra.mxu1 %v1257_v44  ;;  %v1157_v43 = vld [vmem:[%s1654_s6] ss:$0 sm:$0xff]  ;;  %vm1074_vm0 = vcmask 80896  }
 0x2e0   :  { %v982_v45 = vpop.f32.mrb[8].mxu1 }
 0x2e1   :  { %v986_v46 = vmul.f32 %v982_v45, %v982_v45  ;;  %v1245_v47 = vpop.f32.mrb[9].mxu1 }
 0x2e3   :  { %988 = vrot.lane.b32.xlu1 %v986_v46, %s1383_s22 }
 0x355   :  { %v989_v48 = vpop.permute.xlu1 %988 }
 0x356   :  { %v991_v49 = vadd.f32 %v989_v48, %v986_v46 }
 0x358   :  { %1251 = vmatmul.mubr.msk.f32.vlgmr.msra.gmra.mrb[10].mxu1 %vm455_vm1, %v991_v49 }
 0x42b   :  { %v1070_v50 = vpop.f32.mrb[10].mxu1 }
 0x42c   :  { %v1071_v51 = vadd.f32 %v1157_v43, %v1070_v50  ;;  %v1252_v52 = vpop.f32.mrb[11].mxu1 }
 0x42e   :  { %1075 = vst.msk [vmem:[#allocation2] sm:$0xff] %vm1074_vm0, %v1071_v51 }
 0x42f   :  { %1357 = shalt.err (!%p1354_p4)
}
 0x430   :  { %s1358_s29 = scalar_lea.hbm %s1655_s7, 128 }
 0x431   :  { %p1359_p5 = scmp.ne.s32.totalorder %s1655_s7, %s1358_s29  ;;  %p1362_p6 = scmp.lt.u32.totalorder %s1358_s29, %s1655_s7 }
 0x433   :  { %p1364_p7 = pnand %p1362_p6, %p1359_p5 }
 0x435   :  { %1367 = shalt.err (!%p1364_p7)
}
 0x436   :  { %1085 = dma.vmem_to_hbm [thread:$0]  %s1083_s26, 128, %s1655_s7, [#allocation3]  }
 0x437   :  { %1368 = dma.done.wait [#allocation3], 128  }
 0x438   :  { %1369 = vsyncadd [#allocation3], 4294967168 }
 0x439   :  { %1089 = vsyncpa [#allocation3], 1 }

</bundles_post_ra>
